<compile_context>
chip_gen: v7x
topology: tpu7x:2x2x1
jax: 0.10.0
libtpu: 0.0.40
codegen_flags: <defaults>
</compile_context>

<pallas_src>
import jax
import jax.numpy as jnp
from jax.experimental import pallas as pl
from jax.experimental.pallas import tpu as pltpu


def _chomp_copy_kernel(x_ref, o_ref):
    # Column j of the input block maps to column j of the output block, so this
    # lowers to straight vld/vst (static slice when the input block is wider).
    o_ref[...] = x_ref[:, : o_ref.shape[-1]]


def _round_up(x: int, m: int) -> int:
    return ((x + m - 1) // m) * m


def _round_down(x: int, m: int) -> int:
    return (x // m) * m


def _vmem_budget_and_limit() -> tuple[int, int]:
    """(double-buffered block budget, scoped vmem limit), per TPU generation."""
    try:
        cap = int(pltpu.get_tpu_info().vmem_capacity_bytes)
    except Exception:
        cap = 64 * 1024 * 1024  # conservative (v7x-sized) fallback
    # ~3/8 of physical VMEM for blocks, capped at 48 MiB:
    #   v5e/v6e (128 MiB physical) -> 48 MiB of blocks,
    #   v7x     ( 64 MiB physical) -> 24 MiB of blocks,
    # leaving headroom for compiler scratch.
    budget = max(8 * 1024 * 1024, min(cap * 3 // 8, 48 * 1024 * 1024))
    vmem_limit = min(cap, budget + 16 * 1024 * 1024)
    return budget, vmem_limit


def chomp_t(x: jax.Array, chomp: int, *, min_grid_steps: int = 8) -> jax.Array:
    """Pallas implementation of Chomp_T.forward: x[:, :, :-chomp, :]."""
    B, C, T, F = x.shape
    assert 0 < chomp < T, "chomp_t must be in (0, T)"
    T_out = T - chomp

    BC = B * C
    n_keep = T_out * F          # columns kept per (b, c) slab
    full_cols = T * F

    dtype_bytes = jnp.dtype(x.dtype).itemsize
    packing = max(1, 4 // dtype_bytes)   # 1 f32, 2 bf16, 4 int8
    sublane = 8 * packing                # row-tile granularity
    lane = 128                           # column-tile granularity

    budget, vmem_limit = _vmem_budget_and_limit()

    # Lane-dense 2-D view: row bc = (b, c) slab, columns = flattened (t, f).
    x2 = x.reshape(BC, full_cols)

    n_keep_padded = _round_up(n_keep, lane)
    in_cols_single = min(n_keep_padded, full_cols)   # only fetch kept columns
    min_rows = min(BC, sublane)

    # Does a full-kept-width block of the minimum row tile fit the budget
    # (double-buffered input + output)?
    single_fits = (2 * min_rows * (in_cols_single + n_keep) * dtype_bytes
                   <= budget)

    if single_fits:
        # Single column block covering the whole kept width: lane-dense output
        # with no masked column stores.  Tile rows for pipelining / sharding.
        in_tile_cols = in_cols_single
        out_tile_cols = n_keep
        n_col_blocks = 1
        if BC <= sublane:
            tile_bc = BC
        else:
            row_bytes = 2 * (in_tile_cols + out_tile_cols) * dtype_bytes
            budget_rows = _round_down(min(budget // row_bytes, BC), sublane)
            budget_rows = max(sublane, budget_rows)
            # Aim for >= min_grid_steps row blocks (DMA overlap + v7x 2-core
            # sharding) but never below one sublane tile.
            desired_rows = max(sublane,
                               _round_down(pl.cdiv(BC, min_grid_steps), sublane))
            tile_bc = min(budget_rows, desired_rows)
    else:
        # Rows too wide for a single column block: tile the kept width in
        # lane-dense chunks; row tiles stay at sublane granularity.  This is
        # the fallback that keeps huge T_out*F within scoped VMEM.
        tile_bc = min(BC, sublane)
        max_cols = _round_down(budget // (4 * tile_bc * dtype_bytes), lane)
        max_cols = max(lane, max_cols)
        tile_cols = min(max_cols, n_keep_padded)
        in_tile_cols = out_tile_cols = tile_cols
        n_col_blocks = pl.cdiv(n_keep, tile_cols)

    n_row_blocks = pl.cdiv(BC, tile_bc)

    # Guarantee enough grid steps for pipeline overlap even when the whole
    # problem fits one block: split the kept width further (>= 128-lane tiles).
    if (n_row_blocks * n_col_blocks < min_grid_steps
            and n_keep_padded // lane > n_col_blocks):
        want_cols = min(pl.cdiv(min_grid_steps, n_row_blocks),
                        n_keep_padded // lane)
        if want_cols > n_col_blocks:
            tile_cols = max(lane, _round_up(pl.cdiv(n_keep, want_cols), lane))
            in_tile_cols = out_tile_cols = tile_cols
            n_col_blocks = pl.cdiv(n_keep, tile_cols)

    grid = (n_row_blocks, n_col_blocks)

    cost = pl.CostEstimate(
        flops=0,
        transcendentals=0,
        bytes_accessed=2 * BC * n_keep * dtype_bytes,
    )

    out2 = pl.pallas_call(
        _chomp_copy_kernel,
        out_shape=jax.ShapeDtypeStruct((BC, n_keep), x.dtype),
        grid_spec=pltpu.PrefetchScalarGridSpec(
            num_scalar_prefetch=0,
            grid=grid,
            in_specs=[pl.BlockSpec((tile_bc, in_tile_cols), lambda i, j: (i, j))],
            out_specs=pl.BlockSpec((tile_bc, out_tile_cols), lambda i, j: (i, j)),
        ),
        compiler_params=pltpu.CompilerParams(
            dimension_semantics=("parallel", "parallel"),
            vmem_limit_bytes=vmem_limit,
        ),
        cost_estimate=cost,
    )(x2)

    return out2.reshape(B, C, T_out, F)


if __name__ == "__main__":
    key = jax.random.PRNGKey(0)

    # Primary small case consistent with the module's NCHW input convention.
    B, C, T, F = 2, 4, 16, 16
    CHOMP = 3
    x = jax.random.normal(key, (B, C, T, F), dtype=jnp.float32)
    out = jax.block_until_ready(chomp_t(x, CHOMP))
    ref = x[:, :, :-CHOMP, :]
    assert out.shape == ref.shape, (out.shape, ref.shape)
    assert jnp.array_equal(out, ref), "mismatch vs reference slice (case 1)"

    # Second small case exercising the multi-row-block path (BC > sublane).
    B2, C2, T2, F2 = 4, 16, 16, 16
    CHOMP2 = 3
    x2 = jax.random.normal(jax.random.PRNGKey(0), (B2, C2, T2, F2),
                           dtype=jnp.float32)
    out2 = jax.block_until_ready(chomp_t(x2, CHOMP2))
    ref2 = x2[:, :, :-CHOMP2, :]
    assert out2.shape == ref2.shape, (out2.shape, ref2.shape)
    assert jnp.array_equal(out2, ref2), "mismatch vs reference slice (case 2)"

    print("KERNEL_OK")
</pallas_src>

<mosaic_0001>
module attributes {stable_mosaic.version = 11 : i64} {
  func.func @_chomp_copy_kernel(%arg0: i32, %arg1: i32, %arg2: memref<8x128xf32, #tpu.memory_space<vmem>>, %arg3: memref<8x128xf32, #tpu.memory_space<vmem>>) attributes {dimension_semantics = [#tpu.dimension_semantics<parallel>, #tpu.dimension_semantics<parallel>], iteration_bounds = array<i64: 1, 2>, scalar_prefetch = 0 : i64, scratch_operands = 0 : i64, tpu.core_type = #tpu.core_type<tc>, window_params = [{transform_indices = @transform_0, window_bounds = array<i64: 8, 128>}, {transform_indices = @transform_1, window_bounds = array<i64: 8, 128>}]} {
    %c0 = arith.constant 0 : index
    %c0_0 = arith.constant 0 : index
    %0 = vector.load %arg2[%c0, %c0_0] : memref<8x128xf32, #tpu.memory_space<vmem>>, vector<8x128xf32>
    %c0_1 = arith.constant 0 : index
    %c0_2 = arith.constant 0 : index
    %1 = vector.load %arg3[%c0_1, %c0_2] : memref<8x128xf32, #tpu.memory_space<vmem>>, vector<8x128xf32>
    tpu.vector_store %arg3[%c0_1, %c0_2], %0 {strides = array<i32>} : memref<8x128xf32, #tpu.memory_space<vmem>>, vector<8x128xf32>,
    return
  }
  func.func @transform_0(%arg0: i32, %arg1: i32) -> (i32, i32) {
    %c0_i32 = arith.constant 0 : i32
    return %arg0, %arg1 : i32, i32
  }
  func.func @transform_1(%arg0: i32, %arg1: i32) -> (i32, i32) {
    %c0_i32 = arith.constant 0 : i32
    return %arg0, %arg1 : i32, i32
  }
}

</mosaic_0001>

<bundles_post_ra>
// kernel: tpu_custom_call.1
= control target key start
LH: loop header
LB: loop body
LE: loop exit
PB: predicated region body
PF: predicated region fallthrough
CT: control target
= control target key end

     0   :  { %6 = vsyncpa [#allocation3], 0  ;;  %s623_s0 = inlined_call_operand.hbm [shape: f32[8,256], index: 0, kind: input, shape index: {}]   ;;  %s624_s1 = inlined_call_operand.hbm [shape: f32[8,208], index: 1, kind: output, shape index: {}]  }
   0x1   :  { %8 = vsyncpa [#allocation3 + $0x1], 0 }
   0x2   :  { %9 = vsyncpa [#allocation4], 0 }
   0x3   :  { %11 = vsyncpa [#allocation4 + $0x1], 0  ;;  %s451_s6 = smov 0   ;;  %s453_s7 = smov 0  }
   0x4   :  { %s455_s8 = smov 0   ;;  %s457_s9 = smov 0  }
   0x5   :  { %s459_s10 = smov 0   ;;  %s461_s11 = smov 0  }
   0x6 LB: > { %s250_s12 = sadd.s32 4294967295, %s437_s11   ;;  %s251_s13 = sadd.s32 4294967294, %s437_s11   ;;  %s437_s11 = sphi %s461_s11, %s17_s11   ;;  %s433_s10 = sphi %s459_s10, %s640_s10   ;;  %s429_s9 = sphi %s457_s9, %s639_s9   ;;  %s425_s8 = sphi %s455_s8, %s638_s8   ;;  %s421_s7 = sphi %s453_s7, %s637_s7   ;;  %s417_s6 = sphi %s451_s6, %s636_s6  }
   0x7   : > { %s26_s14 = sadd.s32 1, %s433_s10  ;;  %s38_s15 = sadd.s32 1, %s425_s8 }
   0x8   : > { %p27_p0 = scmp.ge.s32.totalorder %s26_s14, 2  ;;  %p45_p1 = scmp.ne.s32.totalorder %s425_s8, %s421_s7 }
   0x9   : > { %p46_p2 = scmp.eq.s32.totalorder %s437_s11, 0  ;;  %p51_p3 = scmp.ne.s32.totalorder %s421_s7, %s417_s6 }
   0xa   : > { %s642_s14 = smov (%p27_p0, %s26_s14), 0  ;;  %p52_p5 = scmp.eq.s32.totalorder %s250_s12, 0 }
   0xb   : > { %p492_p4 = por %p46_p2, %p45_p1  ;;  %s34_s17 = ssub.s32 %s433_s10, %s642_s14 }
   0xc   : > { %p77_p6 = scmp.eq.s32.totalorder %s250_s12, 1  ;;  %p36_p7 = scmp.eq.s32.totalorder %s34_s17, 0 }
   0xd   : > { %p498_p8 = por %p52_p5, %p51_p3  ;;  %p83_p10 = scmp.eq.s32.totalorder %s251_s13, 1 }
   0xe   : > { %p502_p9 = por %p77_p6, %p45_p1  ;;  %p275_p13 = scmp.lt.s32.totalorder %s437_s11, 2 }
   0xf   : > { %s507_s20 = scalar_select %p36_p7, %s425_s8, %s38_s15  }
  0x10   : > { %s628_s19 = scalar_select %p502_p9, 1, 0 }
  0x11   : > { %p509_p11 = por %p83_p10, %p51_p3  ;;  %s103_s22 = sand.u32 1, %s425_s8  }
  0x12   : > { %s254_s23 = sshll.u32 %s103_s22, 3  ;;  %s255_s24 = sshll.u32 %s433_s10, 7 }
  0x13   : > { %s629_s21 = scalar_select %p509_p11, 1, 0 }
  0x14   : > { %s520_s27 = scalar_lea.hbm %s623_s0, %s255_s24  ;;  %s107_s28 = scalar_lea.vmem [#allocation2], %s254_s23 }
  0x15   : > { %s116_s29 = sshll.u32 %s107_s28, 4  ;;  %p526_p0 = pnand %p275_p13, %p492_p4  ;;  %s522_s29 = int_to_ptr.vmem [resolvable:$true] %s116_s29 }
  0x16   : > { %s104_s2 = scalar_lea.sflag [#allocation3], %s103_s22  ;;  %s325_s3 = scalar_lea.hbm %s520_s27, 128 }
  0x17   : > { %p326_p3 = scmp.ne.s32.totalorder %s520_s27, %s325_s3  ;;  %p327_p5 = pneg %p526_p0 }
  0x18   : > { %s330_s12 = scalar_lea.hbm %s623_s0, 256  ;;  %p331_p4 = scmp.lt.u32.totalorder %s520_s27, %s623_s0 }
  0x19   : > { %p328_p6 = pnand %p327_p5, %p326_p3  ;;  %p332_p10 = scmp.lt.u32.totalorder %s330_s12, %s325_s3 }
  0x1a   : > { %p334_p12 = scmp.lt.u32.totalorder %s325_s3, %s520_s27 }
  0x1b   : > { %p329_p7 = pneg %p328_p6  ;;  %p333_p13 = por %p332_p10, %p331_p4 }
  0x1d   : > { %p335_p1 = por %p334_p12, %p333_p13 }
  0x1f   : > { %p336_p2 = pnand %p335_p1, %p329_p7 }
  0x21   : > { %339 = shalt.err (!%p336_p2)
}
  0x22   : > { %s340_s16 = scalar_lea.vmem %s522_s29, 128  ;;  %s439_s17 = smov [#allocation2]  }
  0x23   : > { %p341_p3 = scmp.ne.s32.totalorder %s522_s29, %s340_s16  ;;  %s345_s22 = sshll.u32 %s439_s17, 4  ;;  %s346_s22 = int_to_ptr.vmem [resolvable:$false] %s345_s22 }
  0x24   : > { %s347_s23 = scalar_lea.vmem %s346_s22, 256  ;;  %p348_p9 = scmp.lt.s32.totalorder %s522_s29, %s346_s22 }
  0x25   : > { %p343_p6 = pnand %p341_p3, %p327_p5  ;;  %p349_p4 = scmp.lt.s32.totalorder %s347_s23, %s340_s16 }
  0x27   : > { %p344_p11 = pneg %p343_p6  ;;  %p350_p10 = por %p349_p4, %p348_p9 }
  0x29   : > { %p351_p12 = pnand %p350_p10, %p344_p11 }
  0x2b   : > { %354 = shalt.err (!%p351_p12)
}
  0x2c   : > { %270 = dma.hbm_to_vmem [thread:$0]  (!%p526_p0), %s520_s27, 128, %s522_s29, %s104_s2  }
  0x2d   : > { %p631_p1 = scmp.lt.s32.totalorder %s437_s11, 3  ;;  %p632_p2 = scmp.ge.s32.totalorder %s437_s11, 1 }
  0x2f   : > { %p122_p5 = pnand %p632_p2, %p631_p1 }
  0x30   : > { %s562_s24 = sand.u32 (!%p122_p5), 1, %s421_s7  }
  0x31   : > { %125 = sbr.rel (%p122_p5) target bundleno = 83 (0x53), region = 24  ;;  %s257_s25 = sshll.u32 (!%p122_p5), %s562_s24, 3 }
  0x32   : > { %s128_s26 = scalar_lea.sflag (!%p122_p5), [#allocation3], %s562_s24  ;;  %s131_s28 = scalar_lea.vmem (!%p122_p5), [#allocation2], %s257_s25 }
  0x38   : > { %408 = dma.done.wait (%p498_p8), %s128_s26, 128  }
  0x39   : > { %410 = vsyncadd (%p498_p8), %s128_s26, 4294967168  ;;  %s149_s27 = scalar_lea.vmem [#allocation5], %s257_s25  ;;  %s260_s30 = sshll.u32 %s429_s9, 7  ;;  %v150_v0 = vld [vmem:[%s131_s28] sm:$0xff] }
  0x3a   : > { %s168_s29 = sshll.u32 %s149_s27, 4  ;;  %s576_s4 = scalar_lea.hbm %s624_s1, %s260_s30  ;;  %151 = vst [vmem:[%s149_s27] sm:$0xff] %v150_v0  ;;  %s571_s29 = int_to_ptr.vmem [resolvable:$true] %s168_s29 }
  0x3b   : > { %s153_s18 = scalar_lea.sflag [#allocation4], %s562_s24  ;;  %s355_s5 = scalar_lea.vmem %s571_s29, 128 }
  0x3c   : > { %p356_p8 = scmp.ne.s32.totalorder %s571_s29, %s355_s5  ;;  %p633_p9 = scmp.ne.s32.totalorder %s628_s19, 0 }
  0x3d   : > { %s440_s12 = smov [#allocation5]  }
  0x3e   : > { %p357_p11 = pnand %p356_p8, %p633_p9  ;;  %s359_s9 = sshll.u32 %s440_s12, 4  ;;  %s360_s9 = int_to_ptr.vmem [resolvable:$false] %s359_s9 }
  0x3f   : > { %s361_s13 = scalar_lea.vmem %s360_s9, 256  ;;  %p362_p7 = scmp.lt.s32.totalorder %s571_s29, %s360_s9 }
  0x40   : > { %p358_p0 = pneg %p357_p11  ;;  %p363_p13 = scmp.lt.s32.totalorder %s361_s13, %s355_s5 }
  0x42   : > { %p364_p3 = por %p363_p13, %p362_p7 }
  0x44   : > { %p365_p6 = pnand %p364_p3, %p358_p0 }
  0x46   : > { %368 = shalt.err (!%p365_p6)
}
  0x47   : > { %s369_s15 = scalar_lea.hbm %s576_s4, 128  ;;  %s373_s22 = scalar_lea.hbm %s624_s1, 256 }
  0x48   : > { %p370_p4 = scmp.ne.s32.totalorder %s576_s4, %s369_s15  ;;  %p374_p1 = scmp.lt.u32.totalorder %s576_s4, %s624_s1 }
  0x49   : > { %p375_p2 = scmp.lt.u32.totalorder %s373_s22, %s369_s15  ;;  %p377_p8 = scmp.lt.u32.totalorder %s369_s15, %s576_s4 }
  0x4a   : > { %p371_p10 = pnand %p370_p4, %p633_p9 }
  0x4b   : > { %p376_p5 = por %p375_p2, %p374_p1 }
  0x4c   : > { %p372_p12 = pneg %p371_p10 }
  0x4d   : > { %p378_p11 = por %p377_p8, %p376_p5 }
  0x4f   : > { %p379_p0 = pnand %p378_p11, %p372_p12 }
  0x51   : > { %382 = shalt.err (!%p379_p0)
}
  0x52   : > { %265 = dma.vmem_to_hbm [thread:$0]  (%p633_p9), %s571_s29, 128, %s576_s4, %s153_s18  }
  0x53 PF: > { %s180_s25 = sand.u32 1, %s417_s6   ;;  %p634_p7 = scmp.ne.s32.totalorder %s629_s21, 0 }
  0x54   : > { %p635_p13 = scmp.ge.s32.totalorder %s437_s11, 2  ;;  %s181_s26 = scalar_lea.sflag [#allocation4], %s180_s25 }
  0x56   : > { %p272_p3 = pnand %p635_p13, %p634_p7 }
  0x58   : > { %412 = dma.done.wait (!%p272_p3), %s181_s26, 128  }
  0x59   : > { %414 = vsyncadd (!%p272_p3), %s181_s26, 4294967168  ;;  %s17_s11 = sadd.s32 1, %s437_s11   ;;  %s636_s6 = smov %s421_s7 }
  0x5a   : > { %p14_p6 = scmp.ge.s32.totalorder %s17_s11, 4   ;;  %s637_s7 = smov %s425_s8 }
  0x5b   : > { %s638_s8 = smov %s507_s20  ;;  %s639_s9 = smov %s433_s10 }
  0x5c   : > { %s640_s10 = smov %s642_s14  ;;  %16 = sbr.rel (!%p14_p6) target bundleno = 6 (0x6), region = 69 }
  0x63   :  { %186 = vsyncpa [#allocation3], 1 }
  0x64   :  { %188 = vsyncpa [#allocation3 + $0x1], 1 }
  0x65   :  { %189 = vsyncpa [#allocation4], 1 }
  0x66   :  { %191 = vsyncpa [#allocation4 + $0x1], 1 }

</bundles_post_ra>
